<compile_context>
chip_gen: v7x
topology: tpu7x:2x2x1
jax: 0.10.0
libtpu: 0.0.40
codegen_flags: <defaults>
</compile_context>

<pallas_src>
import jax
import jax.numpy as jnp
from jax.experimental import pallas as pl
from jax.experimental.pallas import tpu as pltpu


# ----------------------------- schedule (glue, plain JAX) -----------------------------
def cosine_schedule(timesteps, s=0.008):
    steps = timesteps + 1
    x = jnp.linspace(0.0, float(steps), steps, dtype=jnp.float32)
    alphas_cumprod = jnp.cos((x / steps + s) / (1.0 + s) * jnp.pi * 0.5) ** 2
    alphas_cumprod = alphas_cumprod / alphas_cumprod[0]
    alphas = alphas_cumprod[1:] / alphas_cumprod[:-1]
    return jnp.clip(alphas, 0.001, 1.0)


def make_diffusion_constants(timesteps):
    alphas = cosine_schedule(timesteps)
    alphas_cumprod = jnp.cumprod(alphas)
    sqrt_alphas_cumprod = jnp.sqrt(alphas_cumprod)
    sqrt_one_minus_alphas_cumprod = jnp.sqrt(1.0 - alphas_cumprod)
    return sqrt_alphas_cumprod, sqrt_one_minus_alphas_cumprod


# ----------------------------- Pallas kernel -----------------------------
def diffusion_loss_kernel(x0_ref, nz_ref, ca_ref, cb_ref, w_ref, add_ref, out_ref):
    # Everything resident in VMEM; single invocation, no accumulator revisit.
    x0 = x0_ref[...]                     # (C, B*HW)
    nz = nz_ref[...]                     # (C, B*HW)

    # q_sample: x_t = sqrt(acp_t) * x_0 + sqrt(1 - acp_t) * noise
    # ca/cb are (1, B*HW) lane rows (per-batch coefficients), broadcast over C sublanes.
    xt = ca_ref[...] * x0 + cb_ref[...] * nz

    # epsilon model: 1x1 conv (channel mix) + (bias + per-sample time embedding),
    # one matmul amortized over all B*HW lanes.
    eps = (jnp.dot(w_ref[...], xt, preferred_element_type=jnp.float32)
           + add_ref[...])               # (C, B*HW)

    # L1 sum over everything (mean normalization done in the wrapper).
    out_ref[...] = jnp.sum(jnp.abs(eps - nz))[None, None]


def diffusion_forward(x0, noise, t, sqrt_acp, sqrt_1m_acp, w, bias, emb_table):
    """Returns F.l1_loss(model(q_sample(x0, t, noise), t), noise)."""
    B, C, H, W = x0.shape
    HW = H * W
    N = B * HW

    # Layout: channels -> sublanes, flattened (batch, spatial) -> lanes.
    x0_f = jnp.transpose(x0, (1, 0, 2, 3)).reshape(C, N).astype(jnp.float32)
    nz_f = jnp.transpose(noise, (1, 0, 2, 3)).reshape(C, N).astype(jnp.float32)

    # extract(a, t, x.shape): per-batch schedule coefficients, pre-broadcast to lane rows.
    ca_row = jnp.broadcast_to(sqrt_acp[t].astype(jnp.float32)[:, None], (B, HW)).reshape(1, N)
    cb_row = jnp.broadcast_to(sqrt_1m_acp[t].astype(jnp.float32)[:, None], (B, HW)).reshape(1, N)

    # bias + per-sample time embedding folded into one additive (C, B*HW) term.
    add_cb = bias.astype(jnp.float32)[:, None] + emb_table[t].astype(jnp.float32).T    # (C, B)
    add_f = jnp.broadcast_to(add_cb[:, :, None], (C, B, HW)).reshape(C, N)

    l1_sum = pl.pallas_call(
        diffusion_loss_kernel,
        out_shape=jax.ShapeDtypeStruct((1, 1), jnp.float32),
        in_specs=[pl.BlockSpec(memory_space=pltpu.MemorySpace.VMEM)] * 6,
        out_specs=pl.BlockSpec(memory_space=pltpu.MemorySpace.VMEM),
    )(x0_f, nz_f, ca_row, cb_row, w.astype(jnp.float32), add_f)

    return l1_sum[0, 0] / (B * C * HW)


# ----------------------------- reference (plain JAX, for sanity) -----------------------------
def diffusion_forward_ref(x0, noise, t, sqrt_acp, sqrt_1m_acp, w, bias, emb_table):
    B, C, H, W = x0.shape
    ca = sqrt_acp[t].reshape(B, 1, 1, 1)
    cb = sqrt_1m_acp[t].reshape(B, 1, 1, 1)
    xt = ca * x0 + cb * noise
    eps = (jnp.einsum("oc,bchw->bohw", w, xt)
           + bias.reshape(1, C, 1, 1)
           + emb_table[t].reshape(B, C, 1, 1))
    return jnp.mean(jnp.abs(eps - noise))


# ----------------------------- main -----------------------------
if __name__ == "__main__":
    B, C, IMG, T = 2, 4, 16, 8   # batch, channels, image_size, timesteps

    key = jax.random.PRNGKey(0)
    k_x, k_n, k_t, k_w, k_e = jax.random.split(key, 5)

    x0 = jax.random.normal(k_x, (B, C, IMG, IMG), dtype=jnp.float32)
    noise = jax.random.normal(k_n, (B, C, IMG, IMG), dtype=jnp.float32)
    # forward() samples t = randint(0, timesteps, (B,)) — done deterministically here
    t = jax.random.randint(k_t, (B,), 0, T)

    # deterministic synthetic model parameters (epsilon-model = 1x1 conv + time embedding)
    w = 0.1 * jax.random.normal(k_w, (C, C), dtype=jnp.float32)
    bias = jnp.linspace(-0.05, 0.05, C, dtype=jnp.float32)
    emb_table = 0.1 * jax.random.normal(k_e, (T, C), dtype=jnp.float32)

    sqrt_acp, sqrt_1m_acp = make_diffusion_constants(T)

    loss = diffusion_forward(x0, noise, t, sqrt_acp, sqrt_1m_acp, w, bias, emb_table)
    loss = jax.block_until_ready(loss)

    ref = diffusion_forward_ref(x0, noise, t, sqrt_acp, sqrt_1m_acp, w, bias, emb_table)
    assert jnp.allclose(loss, ref, rtol=1e-5, atol=1e-5), (loss, ref)

    # TODO(synk): p_sample_loop / sample() (iterative reverse diffusion with fresh Gaussian
    # noise per step) is host-side control flow around the same fused elementwise kernel
    # and is not part of forward(); not implemented here.
    print("KERNEL_OK")
</pallas_src>

<mosaic_0001>
module attributes {stable_mosaic.version = 11 : i64} {
  func.func @diffusion_loss_kernel(%arg0: memref<4x512xf32, #tpu.memory_space<vmem>>, %arg1: memref<4x512xf32, #tpu.memory_space<vmem>>, %arg2: memref<1x512xf32, #tpu.memory_space<vmem>>, %arg3: memref<1x512xf32, #tpu.memory_space<vmem>>, %arg4: memref<4x4xf32, #tpu.memory_space<vmem>>, %arg5: memref<4x512xf32, #tpu.memory_space<vmem>>, %arg6: memref<1x1xf32, #tpu.memory_space<vmem>>) attributes {dimension_semantics = [], scalar_prefetch = 0 : i64, scratch_operands = 0 : i64, tpu.core_type = #tpu.core_type<tc>} {
    %c0 = arith.constant 0 : index
    %c0_0 = arith.constant 0 : index
    %0 = vector.load %arg0[%c0, %c0_0] : memref<4x512xf32, #tpu.memory_space<vmem>>, vector<4x512xf32>
    %c0_1 = arith.constant 0 : index
    %c0_2 = arith.constant 0 : index
    %1 = vector.load %arg1[%c0_1, %c0_2] : memref<4x512xf32, #tpu.memory_space<vmem>>, vector<4x512xf32>
    %c0_3 = arith.constant 0 : index
    %c0_4 = arith.constant 0 : index
    %2 = vector.load %arg2[%c0_3, %c0_4] : memref<1x512xf32, #tpu.memory_space<vmem>>, vector<1x512xf32>
    %3 = vector.broadcast %2 : vector<1x512xf32> to vector<4x512xf32>
    %4 = arith.mulf %3, %0 : vector<4x512xf32>
    %c0_5 = arith.constant 0 : index
    %c0_6 = arith.constant 0 : index
    %5 = vector.load %arg3[%c0_5, %c0_6] : memref<1x512xf32, #tpu.memory_space<vmem>>, vector<1x512xf32>
    %6 = vector.broadcast %5 : vector<1x512xf32> to vector<4x512xf32>
    %7 = arith.mulf %6, %1 : vector<4x512xf32>
    %8 = arith.addf %4, %7 : vector<4x512xf32>
    %c0_7 = arith.constant 0 : index
    %c0_8 = arith.constant 0 : index
    %9 = vector.load %arg4[%c0_7, %c0_8] : memref<4x4xf32, #tpu.memory_space<vmem>>, vector<4x4xf32>
    %cst = arith.constant dense<0.000000e+00> : vector<4x512xf32>
    %10 = tpu.matmul %9, %8, %cst {dimension_numbers = #tpu.dot_dimension_numbers<[1], [0], [0], [1], [0, 0, 1, 1], [], []>} : vector<4x4xf32>, vector<4x512xf32>, vector<4x512xf32> -> vector<4x512xf32>
    %c0_9 = arith.constant 0 : index
    %c0_10 = arith.constant 0 : index
    %11 = vector.load %arg5[%c0_9, %c0_10] : memref<4x512xf32, #tpu.memory_space<vmem>>, vector<4x512xf32>
    %12 = arith.addf %10, %11 : vector<4x512xf32>
    %13 = arith.subf %12, %1 : vector<4x512xf32>
    %14 = math.absf %13 : vector<4x512xf32>
    %15 = vector.shape_cast %14 : vector<4x512xf32> to vector<1x4x512xf32>
    %cst_11 = arith.constant dense<0.000000e+00> : vector<1xf32>
    %16 = vector.multi_reduction <add>, %15, %cst_11 [1, 2] : vector<1x4x512xf32> to vector<1xf32>
    %17 = vector.shape_cast %16 : vector<1xf32> to vector<1x1x1xf32>
    %18 = vector.extract %17[0, 0, 0] : f32 from vector<1x1x1xf32>
    %19 = vector.broadcast %18 : f32 to vector<1x1xf32>
    %c0_12 = arith.constant 0 : index
    %c0_13 = arith.constant 0 : index
    %20 = vector.load %arg6[%c0_12, %c0_13] : memref<1x1xf32, #tpu.memory_space<vmem>>, vector<1x1xf32>
    tpu.vector_store %arg6[%c0_12, %c0_13], %19 {strides = array<i32>} : memref<1x1xf32, #tpu.memory_space<vmem>>, vector<1x1xf32>,
    return
  }
}

</mosaic_0001>

<bundles_post_ra>
// kernel: tpu_custom_call.1
= control target key start
LH: loop header
LB: loop body
LE: loop exit
PB: predicated region body
PF: predicated region fallthrough
CT: control target
= control target key end

     0   :  { %11 = vsyncpa [#allocation3], 0  ;;  %s655_s0 = inlined_call_operand.hbm [shape: f32[4,512], index: 0, kind: input, shape index: {}]   ;;  %s656_s1 = inlined_call_operand.hbm [shape: f32[4,512], index: 1, kind: input, shape index: {}]   ;;  %s657_s2 = inlined_call_operand.hbm [shape: f32[1,512], index: 2, kind: input, shape index: {}]   ;;  %s658_s3 = inlined_call_operand.hbm [shape: f32[1,512], index: 3, kind: input, shape index: {}]   ;;  %s659_s4 = inlined_call_operand.hbm [shape: f32[4,4], index: 4, kind: input, shape index: {}]   ;;  %s660_s5 = inlined_call_operand.vmem [shape: f32[4,512], index: 5, kind: input, shape index: {}]   ;;  %s661_s6 = inlined_call_operand.hbm [shape: f32[1,1], index: 6, kind: output, shape index: {}]  }
   0x1   :  { %12 = vsyncpa [#allocation6], 0 }
   0x2   :  { %13 = vsyncpa [#allocation9], 0 }
   0x3   :  { %14 = vsyncpa [#allocation4], 0  ;;  %s527_s21 = smov [#allocation5]   ;;  %s528_s23 = smov [#allocation8]  }
   0x4   :  { %s31_s22 = sshll.u32 %s527_s21, 4  ;;  %s51_s24 = sshll.u32 %s528_s23, 4  ;;  %s32_s22 = int_to_ptr.vmem [resolvable:$true] %s31_s22  ;;  %s52_s24 = int_to_ptr.vmem [resolvable:$true] %s51_s24 }
   0x5   :  { %s387_s27 = scalar_lea.hbm %s656_s1, 256 }
   0x6   :  { %p388_p0 = scmp.ne.s32.totalorder %s656_s1, %s387_s27  ;;  %p391_p1 = scmp.lt.u32.totalorder %s387_s27, %s656_s1 }
   0x8   :  { %p393_p2 = pnand %p391_p1, %p388_p0 }
   0xa   :  { %396 = shalt.err (!%p393_p2)
}
   0xb   :  { %s397_s8 = scalar_lea.vmem %s32_s22, 256  ;;  %p402_p4 = scmp.lt.s32.totalorder %s32_s22, %s32_s22 }
   0xc   :  { %p398_p3 = scmp.ne.s32.totalorder %s32_s22, %s397_s8  ;;  %p403_p5 = scmp.lt.s32.totalorder %s397_s8, %s397_s8 }
   0xe   :  { %p404_p6 = por %p403_p5, %p402_p4 }
  0x10   :  { %p405_p7 = pnand %p404_p6, %p398_p3 }
  0x12   :  { %408 = shalt.err (!%p405_p7)
}
  0x13   :  { %34 = dma.hbm_to_vmem [thread:$0]  %s656_s1, 256, %s32_s22, [#allocation6]  }
  0x14   :  { %s409_s13 = scalar_lea.hbm %s658_s3, 64 }
  0x15   :  { %p410_p8 = scmp.ne.s32.totalorder %s658_s3, %s409_s13  ;;  %p413_p9 = scmp.lt.u32.totalorder %s409_s13, %s658_s3 }
  0x17   :  { %p415_p10 = pnand %p413_p9, %p410_p8 }
  0x19   :  { %418 = shalt.err (!%p415_p10)
}
  0x1a   :  { %s419_s18 = scalar_lea.vmem %s52_s24, 64  ;;  %p424_p12 = scmp.lt.s32.totalorder %s52_s24, %s52_s24 }
  0x1b   :  { %p420_p11 = scmp.ne.s32.totalorder %s52_s24, %s419_s18  ;;  %p425_p13 = scmp.lt.s32.totalorder %s419_s18, %s419_s18 }
  0x1d   :  { %p426_p0 = por %p425_p13, %p424_p12 }
  0x1f   :  { %p427_p1 = pnand %p426_p0, %p420_p11 }
  0x21   :  { %430 = shalt.err (!%p427_p1)
}
  0x22   :  { %54 = dma.hbm_to_vmem [thread:$0]  %s658_s3, 64, %s52_s24, [#allocation9]  }
  0x23   :  { %s529_s20 = smov [#allocation2]   ;;  %s530_s22 = smov [#allocation7]  }
  0x24   :  { %s21_s21 = sshll.u32 %s529_s20, 4  ;;  %s41_s23 = sshll.u32 %s530_s22, 4  ;;  %s22_s21 = int_to_ptr.vmem [resolvable:$true] %s21_s21  ;;  %s42_s23 = int_to_ptr.vmem [resolvable:$true] %s41_s23 }
  0x25   :  { %s431_s27 = scalar_lea.hbm %s655_s0, 256 }
  0x26   :  { %p432_p2 = scmp.ne.s32.totalorder %s655_s0, %s431_s27  ;;  %p435_p3 = scmp.lt.u32.totalorder %s431_s27, %s655_s0 }
  0x28   :  { %p437_p4 = pnand %p435_p3, %p432_p2 }
  0x2a   :  { %440 = shalt.err (!%p437_p4)
}
  0x2b   :  { %s441_s3 = scalar_lea.vmem %s22_s21, 256  ;;  %p446_p6 = scmp.lt.s32.totalorder %s22_s21, %s22_s21 }
  0x2c   :  { %p442_p5 = scmp.ne.s32.totalorder %s22_s21, %s441_s3  ;;  %p447_p7 = scmp.lt.s32.totalorder %s441_s3, %s441_s3 }
  0x2e   :  { %p448_p8 = por %p447_p7, %p446_p6 }
  0x30   :  { %p449_p9 = pnand %p448_p8, %p442_p5 }
  0x32   :  { %452 = shalt.err (!%p449_p9)
}
  0x33   :  { %24 = dma.hbm_to_vmem [thread:$0]  %s655_s0, 256, %s22_s21, [#allocation3]  }
  0x34   :  { %s453_s11 = scalar_lea.hbm %s657_s2, 64 }
  0x35   :  { %p454_p10 = scmp.ne.s32.totalorder %s657_s2, %s453_s11  ;;  %p457_p11 = scmp.lt.u32.totalorder %s453_s11, %s657_s2 }
  0x37   :  { %p459_p12 = pnand %p457_p11, %p454_p10 }
  0x39   :  { %462 = shalt.err (!%p459_p12)
}
  0x3a   :  { %s463_s16 = scalar_lea.vmem %s42_s23, 64  ;;  %p468_p0 = scmp.lt.s32.totalorder %s42_s23, %s42_s23 }
  0x3b   :  { %p464_p13 = scmp.ne.s32.totalorder %s42_s23, %s463_s16  ;;  %p469_p1 = scmp.lt.s32.totalorder %s463_s16, %s463_s16 }
  0x3d   :  { %p470_p2 = por %p469_p1, %p468_p0 }
  0x3f   :  { %p471_p3 = pnand %p470_p2, %p464_p13 }
  0x41   :  { %474 = shalt.err (!%p471_p3)
}
  0x42   :  { %44 = dma.hbm_to_vmem [thread:$0]  %s657_s2, 64, %s42_s23, [#allocation6]  }
  0x43   :  { %s531_s18 = smov [#allocation10]   ;;  %s475_s21 = scalar_lea.hbm %s659_s4, 64 }
  0x44   :  { %s61_s1 = sshll.u32 %s531_s18, 4  ;;  %p476_p4 = scmp.ne.s32.totalorder %s659_s4, %s475_s21  ;;  %s62_s1 = int_to_ptr.vmem [resolvable:$true] %s61_s1 }
  0x45   :  { %p479_p5 = scmp.lt.u32.totalorder %s475_s21, %s659_s4 }
  0x47   :  { %p481_p6 = pnand %p479_p5, %p476_p4 }
  0x49   :  { %484 = shalt.err (!%p481_p6)
}
  0x4a   :  { %s485_s28 = scalar_lea.vmem %s62_s1, 64  ;;  %p490_p8 = scmp.lt.s32.totalorder %s62_s1, %s62_s1 }
  0x4b   :  { %p486_p7 = scmp.ne.s32.totalorder %s62_s1, %s485_s28  ;;  %p491_p9 = scmp.lt.s32.totalorder %s485_s28, %s485_s28 }
  0x4d   :  { %p492_p10 = por %p491_p9, %p490_p8 }
  0x4f   :  { %p493_p11 = pnand %p492_p10, %p486_p7 }
  0x51   :  { %496 = shalt.err (!%p493_p11)
}
  0x52   :  { %64 = dma.hbm_to_vmem [thread:$0]  %s659_s4, 64, %s62_s1, [#allocation9]  }
  0x53   :  { %519 = dma.done.wait [#allocation3], 256  }
  0x54   :  { %520 = vsyncadd [#allocation3], 4294967040 }
  0x55   :  { %521 = dma.done.wait [#allocation6], 320  }
  0x56   :  { %522 = vsyncadd [#allocation6], 4294966976 }
  0x57   :  { %523 = dma.done.wait [#allocation9], 128  }
  0x58   :  { %524 = vsyncadd [#allocation9], 4294967168  ;;  %v88_v0 = vlaneseq  ;;  %v532_v1 = vmov 0.0   ;;  %v82_v6 = vld [vmem:[#allocation2] sm:$0xff]  ;;  %v84_v7 = vld [vmem:[#allocation5] sm:$0xff]  ;;  %vm167_vm0 = vcmask 1043456  }
  0x59   :  { %244 = vmatprep.mubr.f32.mxu0 %v532_v1  ;;  %315 = vmatprep.mubr.f32.mxu1 %v532_v1  ;;  %v86_v8 = vld [vmem:[#allocation7] sm:$0xf]  ;;  %v110_v11 = vcombine.high %v82_v6, %v82_v6  ;;  %v118_v12 = vld [vmem:[#allocation8] sm:$0xf]  ;;  %v142_v13 = vcombine.high %v84_v7, %v84_v7  ;;  %v83_v15 = vld [vmem:[#allocation2 + $0x8] sm:$0xff]  ;;  %vm163_vm1 = vcmask 31744  }
  0x5a   :  { %v89_v2 = vshrl.u32 %v88_v0, 7  ;;  %v85_v18 = vld [vmem:[#allocation5 + $0x8] sm:$0xff]  ;;  %v111_v20 = vcombine.high %v83_v15, %v83_v15  ;;  %v154_v34 = vld [vmem:[#allocation10] sm:$0xf]  ;;  %v155_v38 = vld [vmem:[%s660_s5] sm:$0xff]  ;;  %vm347_vm2 = vcmask 0  }
  0x5b   :  { %v143_v24 = vcombine.high %v85_v18, %v85_v18  ;;  %v156_v39 = vld [vmem:[%s660_s5 + $0x8] sm:$0xff]  ;;  %v159_v40 = vcombine.high %v155_v38, %v155_v38  ;;  %s533_s5 = smov [#allocation11]  }
  0x5c   :  { %v94_v3 = vsub.s32 1, %v89_v2  ;;  %v90_v4 = vsub.s32 0, %v89_v2  ;;  %v102_v5 = vsub.s32 3, %v89_v2  ;;  %v98_v9 = vsub.s32 2, %v89_v2  ;;  %s355_s3 = sshll.u32 %s533_s5, 4  ;;  %s356_s3 = int_to_ptr.vmem [resolvable:$true] %s355_s3 }
  0x5d   :  { %v160_v42 = vcombine.high %v156_v39, %v156_v39  ;;  %s497_s8 = scalar_lea.vmem %s356_s3, 16  ;;  %s501_s9 = scalar_lea.vmem %s356_s3, 32 }
  0x5e   :  { %v95_v10 = vrot.slane %v86_v8, %v94_v3  ;;  %v91_v14 = vrot.slane %v86_v8, %v90_v4  ;;  %v127_v16 = vrot.slane %v118_v12, %v94_v3  ;;  %v123_v17 = vrot.slane %v118_v12, %v90_v4  ;;  %p498_p12 = scmp.ne.s32.totalorder %s356_s3, %s497_s8  ;;  %p502_p13 = scmp.lt.s32.totalorder %s356_s3, %s356_s3 }
  0x5f   :  { %v103_v19 = vrot.slane %v86_v8, %v102_v5  ;;  %v135_v23 = vrot.slane %v118_v12, %v102_v5  ;;  %v99_v28 = vrot.slane %v86_v8, %v98_v9  ;;  %v131_v30 = vrot.slane %v118_v12, %v98_v9  ;;  %p503_p0 = scmp.lt.s32.totalorder %s501_s9, %s497_s8 }
  0x60   :  { %v115_v21 = vmul.f32 %v110_v11, %v95_v10  ;;  %v114_v22 = vmul.f32 %v91_v14, %v82_v6  ;;  %v147_v25 = vmul.f32 %v142_v13, %v127_v16  ;;  %v146_v26 = vmul.f32 %v123_v17, %v84_v7 }
  0x61   :  { %v117_v27 = vmul.f32 %v111_v20, %v103_v19  ;;  %v149_v29 = vmul.f32 %v143_v24, %v135_v23  ;;  %v116_v33 = vmul.f32 %v99_v28, %v83_v15  ;;  %v148_v36 = vmul.f32 %v131_v30, %v85_v18  ;;  %p504_p1 = por %p503_p0, %p502_p13 }
  0x62   :  { %v151_v31 = vadd.f32 %v147_v25, %v115_v21  ;;  %v150_v32 = vadd.f32 %v146_v26, %v114_v22 }
  0x63   :  { %v153_v35 = vadd.f32 %v149_v29, %v117_v27  ;;  %v152_v37 = vadd.f32 %v148_v36, %v116_v33  ;;  %p505_p2 = pnand %p504_p1, %p498_p12 }
  0x64   :  { %366 = vmatprep.subr.msk.mxu0 %vm167_vm0, %v151_v31 }
  0x65   :  { %367 = vmatpush1.msk.msra.mxu0 %vm167_vm0, %v150_v32  ;;  %369 = vmatprep.subr.msk.mxu1 %vm167_vm0, %v153_v35 }
  0x66   :  { %368 = vmatmul.mubr.msk.f32.vlgmr.msra.gmra.mrb[0].mxu0 %vm163_vm1, %v154_v34  ;;  %370 = vmatpush1.msk.msra.mxu1 %vm167_vm0, %v152_v37 }
  0x67   :  { %371 = vmatmul.mubr.msk.f32.vlgmr.msra.gmra.mrb[0].mxu1 %vm163_vm1, %v154_v34 }
 0x139   :  { %v246_v41 = vpop.f32.mrb[0].mxu0 }
 0x13a   :  { %v247_v43 = vadd.f32 %v246_v41, %v155_v38  ;;  %v248_v44 = vpop.f32.mrb[1].mxu0  ;;  %v317_v46 = vpop.f32.mrb[0].mxu1 }
 0x13b   :  { %v249_v45 = vadd.f32 %v248_v44, %v159_v40  ;;  %v318_v48 = vadd.f32 %v317_v46, %v156_v39  ;;  %v319_v49 = vpop.f32.mrb[1].mxu1 }
 0x13c   :  { %v322_v47 = vsub.f32 %v247_v43, %v84_v7  ;;  %v320_v51 = vadd.f32 %v319_v49, %v160_v42 }
 0x13d   :  { %v323_v50 = vsub.f32 %v249_v45, %v142_v13  ;;  %v324_v53 = vsub.f32 %v318_v48, %v85_v18 }
 0x13e   :  { %v326_v52 = vand.u32 2147483647, %v322_v47  ;;  %v325_v55 = vsub.f32 %v320_v51, %v143_v24 }
 0x13f   :  { %v327_v54 = vand.u32 2147483647, %v323_v50  ;;  %v328_v56 = vand.u32 2147483647, %v324_v53 }
 0x140   :  { %v330_v57 = vsel %vm167_vm0, %v326_v52, 0.0  ;;  %v329_v58 = vand.u32 2147483647, %v325_v55 }
 0x141   :  { %v331_v59 = vsel %vm167_vm0, %v327_v54, 0.0  ;;  %v333_v61 = vsel %vm167_vm0, %v328_v56, 0.0 }
 0x142   :  { %v332_v60 = vadd.f32 %v331_v59, %v330_v57  ;;  %v335_v63 = vsel %vm167_vm0, %v329_v58, 0.0 }
 0x144   :  { %v334_v62 = vadd.f32 %v333_v61, %v332_v60 }
 0x146   :  { %v336_v0 = vadd.f32 %v335_v63, %v334_v62 }
 0x148   :  { %337 = vadd.xlane.f32.xlu0 %v336_v0 }
 0x1d5   :  { %v338_v1 = vpop.xlane.xlu0 %337 }
 0x1d6   :  { %v339_v2 = vrot.slane %v338_v1, 4 }
 0x1d8   :  { %v340_v3 = vadd.f32 %v339_v2, %v338_v1 }
 0x1da   :  { %v341_v4 = vrot.slane %v340_v3, 2 }
 0x1dc   :  { %v342_v5 = vadd.f32 %v341_v4, %v340_v3 }
 0x1de   :  { %v343_v6 = vrot.slane %v342_v5, 1 }
 0x1e0   :  { %v344_v7 = vadd.f32 %v343_v6, %v342_v5 }
 0x1e2   :  { %372 = vpush %v344_v7 }
 0x213   :  { %s373_s24 = spop %372 }
 0x214   :  { %v346_v8 = vstv %s373_s24 }
 0x215   :  { %348 = vst.msk [vmem:[#allocation11] sm:$0x1] %vm347_vm2, %v346_v8 }
 0x216   :  { %508 = shalt.err (!%p505_p2)
}
 0x217   :  { %s509_s12 = scalar_lea.hbm %s661_s6, 16 }
 0x218   :  { %p510_p3 = scmp.ne.s32.totalorder %s661_s6, %s509_s12  ;;  %p513_p4 = scmp.lt.u32.totalorder %s509_s12, %s661_s6 }
 0x21a   :  { %p515_p5 = pnand %p513_p4, %p510_p3 }
 0x21c   :  { %518 = shalt.err (!%p515_p5)
}
 0x21d   :  { %358 = dma.vmem_to_hbm [thread:$0]  %s356_s3, 16, %s661_s6, [#allocation4]  }
 0x21e   :  { %525 = dma.done.wait [#allocation4], 16  }
 0x21f   :  { %526 = vsyncadd [#allocation4], 4294967280 }
 0x220   :  { %362 = vsyncpa [#allocation3], 1 }
 0x221   :  { %363 = vsyncpa [#allocation6], 1 }
 0x222   :  { %364 = vsyncpa [#allocation9], 1 }
 0x223   :  { %365 = vsyncpa [#allocation4], 1 }

</bundles_post_ra>
